<compile_context>
chip_gen: v7x
topology: tpu7x:2x2x1
jax: 0.10.0
libtpu: 0.0.40
codegen_flags: <defaults>
</compile_context>

<pallas_src>
import functools

import jax
import jax.numpy as jnp
from jax.experimental import pallas as pl
from jax.experimental.pallas import tpu as pltpu


def _make_kernel(kh, kw, stride, wg, n_lanes):
    """Builds the fused conv+relu+pool kernel for static conv geometry."""
    g2 = 2 * stride  # number of column phase groups (pool parity x stride)

    def kernel(zb_ref, w_ref, b_ref, o_ref):
        # zb_ref : (1, G, C, band_L)  phase-split, row-banded, padded input
        # w_ref  : (KH*KW, OC, C)     conv weight, resident in VMEM
        # b_ref  : (OC, 1)            conv bias, resident
        # o_ref  : (1, OC, TOH*Wg)    pooled output block (lane-dense)
        oc = w_ref.shape[1]
        acc = [jnp.zeros((oc, n_lanes), jnp.float32) for _ in range(2)]
        for ih in range(kh):                       # static, fully unrolled
            row_grp, row_off = ih % stride, ih // stride
            for iw in range(kw):
                w_kk = w_ref[ih * kw + iw]         # (OC, C)
                for par in range(2):               # even / odd pool column
                    q = par * stride + iw
                    col_grp, col_off = q % g2, q // g2
                    gidx = row_grp * g2 + col_grp
                    start = row_off * wg + col_off
                    xs = zb_ref[0, gidx, :, start:start + n_lanes]   # (C, L)
                    acc[par] = acc[par] + jnp.dot(
                        w_kk, xs, preferred_element_type=jnp.float32)
        # MaxPool2d((1,2)) == max(even, odd); one bias add + one ReLU after it.
        y = jnp.maximum(acc[0], acc[1]) + b_ref[...]
        o_ref[0] = jnp.maximum(y, 0.0).astype(o_ref.dtype)

    return kernel


def _pick_row_tile(oh, wg, n, bytes_per_lane):
    # Target 1024-2048 lanes per output block (review item #4), bounded so the
    # double-buffered band stays small, with >= 2 grid steps and preferably an
    # even grid length (v7x has two TensorCores sharing the parallel axis).
    target = max(128, min(2048, (2 * 1024 * 1024) // max(bytes_per_lane, 1)))
    toh0 = max(1, min(oh, target // max(wg, 1)))
    r = -(-oh // toh0)
    if n * r < 2 and oh >= 2:
        r = max(r, 2)
    if (n * r) % 2 == 1 and r < oh:
        r += 1
    toh = -(-oh // r)
    return toh, r


@functools.partial(
    jax.jit, static_argnames=("kernel_size", "stride", "padding", "use_bf16"))
def conv2dblock_forward(x, weight, bias, *, kernel_size, stride, padding,
                        use_bf16=True):
    """Equivalent of conv2dblock.forward. x: (N,C,H,W) -> (N,OC,OH,OW//2)."""
    n, c, h, w = x.shape
    oc = weight.shape[0]
    kh = kw = int(kernel_size)
    s = int(stride)
    p = int(padding)

    oh = (h + 2 * p - kh) // s + 1
    ow = (w + 2 * p - kw) // s + 1
    owp = ow // 2                       # MaxPool2d((1,2),(1,2)), floor mode
    assert oh >= 1 and owp >= 1, "output too small for the (1,2) max-pool"

    g2 = 2 * s                          # column phase groups
    g = s * g2                          # total (row phase x column phase) groups
    a_max = (s + kw - 1) // g2          # max in-group column offset used in-kernel
    b_max = (kh - 1) // s               # max in-group row offset used in-kernel
    wg = owp + a_max                    # in-group width as seen by the kernel

    cdtype = jnp.bfloat16 if use_bf16 else x.dtype
    itemsize = jnp.dtype(cdtype).itemsize
    toh, r = _pick_row_tile(oh, wg, n, g * c * itemsize)
    oh_pad = r * toh
    hg = oh_pad + b_max + 1             # in-group rows (incl. lane-window slack)
    band_rows = toh + b_max + 1
    band_l = band_rows * wg
    n_lanes = toh * wg                  # output lanes per grid step

    # ---- one cheap pass over x: pad -> phase split -> row bands -> flatten ----
    hp, wp = h + 2 * p, w + 2 * p
    tgt_h, tgt_w = hg * s, wg * g2
    xp = jnp.pad(x.astype(cdtype), ((0, 0), (0, 0), (p, p), (p, p)))
    xp = xp[:, :, :min(hp, tgt_h), :min(wp, tgt_w)]
    xp = jnp.pad(xp, ((0, 0), (0, 0),
                      (0, tgt_h - xp.shape[2]), (0, tgt_w - xp.shape[3])))
    # (N, C, Hg, S, Wg, 2S) -> (N, S, 2S, C, Hg, Wg): groups leading, spatial last
    zg = xp.reshape(n, c, hg, s, wg, g2).transpose(0, 3, 5, 1, 2, 4)
    zg = zg.reshape(n, g, c, hg, wg)
    # Overlapping row bands (tiny halo of b_max+1 rows), rows*width -> lanes.
    zb = jnp.stack(
        [zg[:, :, :, i * toh:i * toh + band_rows, :] for i in range(r)], axis=1)
    zb = zb.reshape(n * r, g, c, band_l)

    # Reorder the tiny weight tensor (not the activations) to the kernel layout.
    w_mat = weight.transpose(2, 3, 0, 1).reshape(kh * kw, oc, c).astype(cdtype)
    b_mat = bias.reshape(oc, 1).astype(jnp.float32)

    out_dtype = jnp.bfloat16 if use_bf16 else jnp.float32
    kernel = _make_kernel(kh, kw, s, wg, n_lanes)

    out = pl.pallas_call(
        kernel,
        out_shape=jax.ShapeDtypeStruct((n * r, oc, n_lanes), out_dtype),
        grid_spec=pltpu.PrefetchScalarGridSpec(
            num_scalar_prefetch=0,
            grid=(n * r,),
            in_specs=[
                pl.BlockSpec((1, g, c, band_l), lambda i: (i, 0, 0, 0)),  # bands
                pl.BlockSpec((kh * kw, oc, c), lambda i: (0, 0, 0)),      # weight
                pl.BlockSpec((oc, 1), lambda i: (0, 0)),                  # bias
            ],
            out_specs=pl.BlockSpec((1, oc, n_lanes), lambda i: (i, 0, 0)),
        ),
        compiler_params=pltpu.CompilerParams(
            dimension_semantics=("parallel",),
            vmem_limit_bytes=32 * 1024 * 1024,   # usage is well under 1 MiB
        ),
    )(zb, w_mat, b_mat)

    # (N*R, OC, TOH*Wg) -> (N, OC, OH, OWp); this small epilogue pass also
    # absorbs the bf16 -> caller-dtype cast, so kernel writeback stays half-width.
    out = out.reshape(n, r, oc, toh, wg).transpose(0, 2, 1, 3, 4)
    out = out.reshape(n, oc, oh_pad, wg)[:, :, :oh, :owp]
    return out.astype(x.dtype)


def _reference(x, weight, bias, *, stride, padding):
    """Pure-JAX reference (conv + bias + relu + maxpool (1,2))."""
    y = jax.lax.conv_general_dilated(
        x, weight, window_strides=(stride, stride),
        padding=[(padding, padding), (padding, padding)],
        dimension_numbers=("NCHW", "OIHW", "NCHW"))
    y = y + bias.reshape(1, -1, 1, 1)
    y = jnp.maximum(y, 0.0)
    n, c, h, w = y.shape
    y = y[:, :, :, :(w // 2) * 2].reshape(n, c, h, w // 2, 2).max(axis=-1)
    return y


if __name__ == "__main__":
    # Small shapes consistent with the module: Conv2d(4 -> 8, k=3, s=1, p=1)
    N, C, OCH, H, W = 2, 4, 8, 16, 16
    KS, STRIDE, PAD = 3, 1, 1

    key = jax.random.PRNGKey(0)
    k1, k2, k3 = jax.random.split(key, 3)
    x = jax.random.normal(k1, (N, C, H, W), dtype=jnp.float32)
    weight = jax.random.normal(k2, (OCH, C, KS, KS), dtype=jnp.float32) * 0.1
    bias = jax.random.normal(k3, (OCH,), dtype=jnp.float32) * 0.1

    ref = _reference(x, weight, bias, stride=STRIDE, padding=PAD)

    # f32 operand path: exact vs the XLA reference.
    out_f32 = jax.block_until_ready(conv2dblock_forward(
        x, weight, bias, kernel_size=KS, stride=STRIDE, padding=PAD,
        use_bf16=False))
    assert out_f32.shape == (N, OCH, H, W // 2), out_f32.shape
    assert jnp.allclose(out_f32, ref, atol=1e-4, rtol=1e-4), "f32 mismatch"

    # Default (bf16-operand) path: compare against a bf16-operand reference.
    ref_bf16 = _reference(
        x.astype(jnp.bfloat16).astype(jnp.float32),
        weight.astype(jnp.bfloat16).astype(jnp.float32),
        bias, stride=STRIDE, padding=PAD)
    out_bf16 = jax.block_until_ready(conv2dblock_forward(
        x, weight, bias, kernel_size=KS, stride=STRIDE, padding=PAD))
    assert out_bf16.shape == (N, OCH, H, W // 2), out_bf16.shape
    assert jnp.allclose(out_bf16, ref_bf16, atol=1e-2, rtol=1e-2), "bf16 mismatch"

    print("KERNEL_OK")
</pallas_src>

<mosaic_0001>
module attributes {stable_mosaic.version = 11 : i64} {
  func.func @kernel(%arg0: i32, %arg1: memref<1x2x4x171xf32, #tpu.memory_space<vmem>>, %arg2: memref<9x8x4xf32, #tpu.memory_space<vmem>>, %arg3: memref<8x1xf32, #tpu.memory_space<vmem>>, %arg4: memref<1x8x144xf32, #tpu.memory_space<vmem>>) attributes {dimension_semantics = [#tpu.dimension_semantics<parallel>], iteration_bounds = array<i64: 2>, scalar_prefetch = 0 : i64, scratch_operands = 0 : i64, tpu.core_type = #tpu.core_type<tc>, window_params = [{transform_indices = @transform_0, window_bounds = array<i64: 1, 2, 4, 171>}, {pipeline_mode = #tpu.pipeline_mode<synchronous>, transform_indices = @transform_1, window_bounds = array<i64: 9, 8, 4>}, {pipeline_mode = #tpu.pipeline_mode<synchronous>, transform_indices = @transform_2, window_bounds = array<i64: 8, 1>}, {transform_indices = @transform_3, window_bounds = array<i64: 1, 8, 144>}]} {
    %cst = arith.constant 0.000000e+00 : f32
    %0 = vector.broadcast %cst : f32 to vector<8x144xf32>
    %cst_0 = arith.constant 0.000000e+00 : f32
    %1 = vector.broadcast %cst_0 : f32 to vector<8x144xf32>
    %c0 = arith.constant 0 : index
    %c0_1 = arith.constant 0 : index
    %c0_2 = arith.constant 0 : index
    %2 = vector.load %arg2[%c0, %c0_1, %c0_2] : memref<9x8x4xf32, #tpu.memory_space<vmem>>, vector<1x8x4xf32>
    %3 = vector.shape_cast %2 : vector<1x8x4xf32> to vector<8x4xf32>
    %c0_3 = arith.constant 0 : index
    %c0_4 = arith.constant 0 : index
    %c0_5 = arith.constant 0 : index
    %c0_6 = arith.constant 0 : index
    %4 = vector.load %arg1[%c0_3, %c0_4, %c0_5, %c0_6] : memref<1x2x4x171xf32, #tpu.memory_space<vmem>>, vector<1x1x4x144xf32>
    %5 = vector.shape_cast %4 : vector<1x1x4x144xf32> to vector<4x144xf32>
    %cst_7 = arith.constant dense<0.000000e+00> : vector<8x144xf32>
    %6 = tpu.matmul %3, %5, %cst_7 {dimension_numbers = #tpu.dot_dimension_numbers<[1], [0], [0], [1], [0, 0, 1, 1], [], []>} : vector<8x4xf32>, vector<4x144xf32>, vector<8x144xf32> -> vector<8x144xf32>
    %7 = arith.addf %0, %6 : vector<8x144xf32>
    %c0_8 = arith.constant 0 : index
    %c1 = arith.constant 1 : index
    %c0_9 = arith.constant 0 : index
    %c0_10 = arith.constant 0 : index
    %8 = vector.load %arg1[%c0_8, %c1, %c0_9, %c0_10] : memref<1x2x4x171xf32, #tpu.memory_space<vmem>>, vector<1x1x4x144xf32>
    %9 = vector.shape_cast %8 : vector<1x1x4x144xf32> to vector<4x144xf32>
    %cst_11 = arith.constant dense<0.000000e+00> : vector<8x144xf32>
    %10 = tpu.matmul %3, %9, %cst_11 {dimension_numbers = #tpu.dot_dimension_numbers<[1], [0], [0], [1], [0, 0, 1, 1], [], []>} : vector<8x4xf32>, vector<4x144xf32>, vector<8x144xf32> -> vector<8x144xf32>
    %11 = arith.addf %1, %10 : vector<8x144xf32>
    %c1_12 = arith.constant 1 : index
    %c0_13 = arith.constant 0 : index
    %c0_14 = arith.constant 0 : index
    %12 = vector.load %arg2[%c1_12, %c0_13, %c0_14] : memref<9x8x4xf32, #tpu.memory_space<vmem>>, vector<1x8x4xf32>
    %13 = vector.shape_cast %12 : vector<1x8x4xf32> to vector<8x4xf32>
    %c0_15 = arith.constant 0 : index
    %c1_16 = arith.constant 1 : index
    %c0_17 = arith.constant 0 : index
    %c0_18 = arith.constant 0 : index
    %14 = vector.load %arg1[%c0_15, %c1_16, %c0_17, %c0_18] : memref<1x2x4x171xf32, #tpu.memory_space<vmem>>, vector<1x1x4x144xf32>
    %15 = vector.shape_cast %14 : vector<1x1x4x144xf32> to vector<4x144xf32>
    %cst_19 = arith.constant dense<0.000000e+00> : vector<8x144xf32>
    %16 = tpu.matmul %13, %15, %cst_19 {dimension_numbers = #tpu.dot_dimension_numbers<[1], [0], [0], [1], [0, 0, 1, 1], [], []>} : vector<8x4xf32>, vector<4x144xf32>, vector<8x144xf32> -> vector<8x144xf32>
    %17 = arith.addf %7, %16 : vector<8x144xf32>
    %c0_20 = arith.constant 0 : index
    %c0_21 = arith.constant 0 : index
    %c0_22 = arith.constant 0 : index
    %c1_23 = arith.constant 1 : index
    %18 = vector.load %arg1[%c0_20, %c0_21, %c0_22, %c1_23] : memref<1x2x4x171xf32, #tpu.memory_space<vmem>>, vector<1x1x4x144xf32>
    %19 = vector.shape_cast %18 : vector<1x1x4x144xf32> to vector<4x144xf32>
    %cst_24 = arith.constant dense<0.000000e+00> : vector<8x144xf32>
    %20 = tpu.matmul %13, %19, %cst_24 {dimension_numbers = #tpu.dot_dimension_numbers<[1], [0], [0], [1], [0, 0, 1, 1], [], []>} : vector<8x4xf32>, vector<4x144xf32>, vector<8x144xf32> -> vector<8x144xf32>
    %21 = arith.addf %11, %20 : vector<8x144xf32>
    %c2 = arith.constant 2 : index
    %c0_25 = arith.constant 0 : index
    %c0_26 = arith.constant 0 : index
    %22 = vector.load %arg2[%c2, %c0_25, %c0_26] : memref<9x8x4xf32, #tpu.memory_space<vmem>>, vector<1x8x4xf32>
    %23 = vector.shape_cast %22 : vector<1x8x4xf32> to vector<8x4xf32>
    %c0_27 = arith.constant 0 : index
    %c0_28 = arith.constant 0 : index
    %c0_29 = arith.constant 0 : index
    %c1_30 = arith.constant 1 : index
    %24 = vector.load %arg1[%c0_27, %c0_28, %c0_29, %c1_30] : memref<1x2x4x171xf32, #tpu.memory_space<vmem>>, vector<1x1x4x144xf32>
    %25 = vector.shape_cast %24 : vector<1x1x4x144xf32> to vector<4x144xf32>
    %cst_31 = arith.constant dense<0.000000e+00> : vector<8x144xf32>
    %26 = tpu.matmul %23, %25, %cst_31 {dimension_numbers = #tpu.dot_dimension_numbers<[1], [0], [0], [1], [0, 0, 1, 1], [], []>} : vector<8x4xf32>, vector<4x144xf32>, vector<8x144xf32> -> vector<8x144xf32>
    %27 = arith.addf %17, %26 : vector<8x144xf32>
    %c0_32 = arith.constant 0 : index
    %c1_33 = arith.constant 1 : index
    %c0_34 = arith.constant 0 : index
    %c1_35 = arith.constant 1 : index
    %28 = vector.load %arg1[%c0_32, %c1_33, %c0_34, %c1_35] : memref<1x2x4x171xf32, #tpu.memory_space<vmem>>, vector<1x1x4x144xf32>
    %29 = vector.shape_cast %28 : vector<1x1x4x144xf32> to vector<4x144xf32>
    %cst_36 = arith.constant dense<0.000000e+00> : vector<8x144xf32>
    %30 = tpu.matmul %23, %29, %cst_36 {dimension_numbers = #tpu.dot_dimension_numbers<[1], [0], [0], [1], [0, 0, 1, 1], [], []>} : vector<8x4xf32>, vector<4x144xf32>, vector<8x144xf32> -> vector<8x144xf32>
    %31 = arith.addf %21, %30 : vector<8x144xf32>
    %c3 = arith.constant 3 : index
    %c0_37 = arith.constant 0 : index
    %c0_38 = arith.constant 0 : index
    %32 = vector.load %arg2[%c3, %c0_37, %c0_38] : memref<9x8x4xf32, #tpu.memory_space<vmem>>, vector<1x8x4xf32>
    %33 = vector.shape_cast %32 : vector<1x8x4xf32> to vector<8x4xf32>
    %c0_39 = arith.constant 0 : index
    %c0_40 = arith.constant 0 : index
    %c0_41 = arith.constant 0 : index
    %c9 = arith.constant 9 : index
    %34 = vector.load %arg1[%c0_39, %c0_40, %c0_41, %c9] : memref<1x2x4x171xf32, #tpu.memory_space<vmem>>, vector<1x1x4x144xf32>
    %35 = vector.shape_cast %34 : vector<1x1x4x144xf32> to vector<4x144xf32>
    %cst_42 = arith.constant dense<0.000000e+00> : vector<8x144xf32>
    %36 = tpu.matmul %33, %35, %cst_42 {dimension_numbers = #tpu.dot_dimension_numbers<[1], [0], [0], [1], [0, 0, 1, 1], [], []>} : vector<8x4xf32>, vector<4x144xf32>, vector<8x144xf32> -> vector<8x144xf32>
    %37 = arith.addf %27, %36 : vector<8x144xf32>
    %c0_43 = arith.constant 0 : index
    %c1_44 = arith.constant 1 : index
    %c0_45 = arith.constant 0 : index
    %c9_46 = arith.constant 9 : index
    %38 = vector.load %arg1[%c0_43, %c1_44, %c0_45, %c9_46] : memref<1x2x4x171xf32, #tpu.memory_space<vmem>>, vector<1x1x4x144xf32>
    %39 = vector.shape_cast %38 : vector<1x1x4x144xf32> to vector<4x144xf32>
    %cst_47 = arith.constant dense<0.000000e+00> : vector<8x144xf32>
    %40 = tpu.matmul %33, %39, %cst_47 {dimension_numbers = #tpu.dot_dimension_numbers<[1], [0], [0], [1], [0, 0, 1, 1], [], []>} : vector<8x4xf32>, vector<4x144xf32>, vector<8x144xf32> -> vector<8x144xf32>
    %41 = arith.addf %31, %40 : vector<8x144xf32>
    %c4 = arith.constant 4 : index
    %c0_48 = arith.constant 0 : index
    %c0_49 = arith.constant 0 : index
    %42 = vector.load %arg2[%c4, %c0_48, %c0_49] : memref<9x8x4xf32, #tpu.memory_space<vmem>>, vector<1x8x4xf32>
    %43 = vector.shape_cast %42 : vector<1x8x4xf32> to vector<8x4xf32>
    %c0_50 = arith.constant 0 : index
    %c1_51 = arith.constant 1 : index
    %c0_52 = arith.constant 0 : index
    %c9_53 = arith.constant 9 : index
    %44 = vector.load %arg1[%c0_50, %c1_51, %c0_52, %c9_53] : memref<1x2x4x171xf32, #tpu.memory_space<vmem>>, vector<1x1x4x144xf32>
    %45 = vector.shape_cast %44 : vector<1x1x4x144xf32> to vector<4x144xf32>
    %cst_54 = arith.constant dense<0.000000e+00> : vector<8x144xf32>
    %46 = tpu.matmul %43, %45, %cst_54 {dimension_numbers = #tpu.dot_dimension_numbers<[1], [0], [0], [1], [0, 0, 1, 1], [], []>} : vector<8x4xf32>, vector<4x144xf32>, vector<8x144xf32> -> vector<8x144xf32>
    %47 = arith.addf %37, %46 : vector<8x144xf32>
    %c0_55 = arith.constant 0 : index
    %c0_56 = arith.constant 0 : index
    %c0_57 = arith.constant 0 : index
    %c10 = arith.constant 10 : index
    %48 = vector.load %arg1[%c0_55, %c0_56, %c0_57, %c10] : memref<1x2x4x171xf32, #tpu.memory_space<vmem>>, vector<1x1x4x144xf32>
    %49 = vector.shape_cast %48 : vector<1x1x4x144xf32> to vector<4x144xf32>
    %cst_58 = arith.constant dense<0.000000e+00> : vector<8x144xf32>
    %50 = tpu.matmul %43, %49, %cst_58 {dimension_numbers = #tpu.dot_dimension_numbers<[1], [0], [0], [1], [0, 0, 1, 1], [], []>} : vector<8x4xf32>, vector<4x144xf32>, vector<8x144xf32> -> vector<8x144xf32>
    %51 = arith.addf %41, %50 : vector<8x144xf32>
    %c5 = arith.constant 5 : index
    %c0_59 = arith.constant 0 : index
    %c0_60 = arith.constant 0 : index
    %52 = vector.load %arg2[%c5, %c0_59, %c0_60] : memref<9x8x4xf32, #tpu.memory_space<vmem>>, vector<1x8x4xf32>
    %53 = vector.shape_cast %52 : vector<1x8x4xf32> to vector<8x4xf32>
    %c0_61 = arith.constant 0 : index
    %c0_62 = arith.constant 0 : index
    %c0_63 = arith.constant 0 : index
    %c10_64 = arith.constant 10 : index
    %54 = vector.load %arg1[%c0_61, %c0_62, %c0_63, %c10_64] : memref<1x2x4x171xf32, #tpu.memory_space<vmem>>, vector<1x1x4x144xf32>
    %55 = vector.shape_cast %54 : vector<1x1x4x144xf32> to vector<4x144xf32>
    %cst_65 = arith.constant dense<0.000000e+00> : vector<8x144xf32>
    %56 = tpu.matmul %53, %55, %cst_65 {dimension_numbers = #tpu.dot_dimension_numbers<[1], [0], [0], [1], [0, 0, 1, 1], [], []>} : vector<8x4xf32>, vector<4x144xf32>, vector<8x144xf32> -> vector<8x144xf32>
    %57 = arith.addf %47, %56 : vector<8x144xf32>
    %c0_66 = arith.constant 0 : index
    %c1_67 = arith.constant 1 : index
    %c0_68 = arith.constant 0 : index
    %c10_69 = arith.constant 10 : index
    %58 = vector.load %arg1[%c0_66, %c1_67, %c0_68, %c10_69] : memref<1x2x4x171xf32, #tpu.memory_space<vmem>>, vector<1x1x4x144xf32>
    %59 = vector.shape_cast %58 : vector<1x1x4x144xf32> to vector<4x144xf32>
    %cst_70 = arith.constant dense<0.000000e+00> : vector<8x144xf32>
    %60 = tpu.matmul %53, %59, %cst_70 {dimension_numbers = #tpu.dot_dimension_numbers<[1], [0], [0], [1], [0, 0, 1, 1], [], []>} : vector<8x4xf32>, vector<4x144xf32>, vector<8x144xf32> -> vector<8x144xf32>
    %61 = arith.addf %51, %60 : vector<8x144xf32>
    %c6 = arith.constant 6 : index
    %c0_71 = arith.constant 0 : index
    %c0_72 = arith.constant 0 : index
    %62 = vector.load %arg2[%c6, %c0_71, %c0_72] : memref<9x8x4xf32, #tpu.memory_space<vmem>>, vector<1x8x4xf32>
    %63 = vector.shape_cast %62 : vector<1x8x4xf32> to vector<8x4xf32>
    %c0_73 = arith.constant 0 : index
    %c0_74 = arith.constant 0 : index
    %c0_75 = arith.constant 0 : index
    %c18 = arith.constant 18 : index
    %64 = vector.load %arg1[%c0_73, %c0_74, %c0_75, %c18] : memref<1x2x4x171xf32, #tpu.memory_space<vmem>>, vector<1x1x4x144xf32>
    %65 = vector.shape_cast %64 : vector<1x1x4x144xf32> to vector<4x144xf32>
    %cst_76 = arith.constant dense<0.000000e+00> : vector<8x144xf32>
    %66 = tpu.matmul %63, %65, %cst_76 {dimension_numbers = #tpu.dot_dimension_numbers<[1], [0], [0], [1], [0, 0, 1, 1], [], []>} : vector<8x4xf32>, vector<4x144xf32>, vector<8x144xf32> -> vector<8x144xf32>
    %67 = arith.addf %57, %66 : vector<8x144xf32>
    %c0_77 = arith.constant 0 : index
    %c1_78 = arith.constant 1 : index
    %c0_79 = arith.constant 0 : index
    %c18_80 = arith.constant 18 : index
    %68 = vector.load %arg1[%c0_77, %c1_78, %c0_79, %c18_80] : memref<1x2x4x171xf32, #tpu.memory_space<vmem>>, vector<1x1x4x144xf32>
    %69 = vector.shape_cast %68 : vector<1x1x4x144xf32> to vector<4x144xf32>
    %cst_81 = arith.constant dense<0.000000e+00> : vector<8x144xf32>
    %70 = tpu.matmul %63, %69, %cst_81 {dimension_numbers = #tpu.dot_dimension_numbers<[1], [0], [0], [1], [0, 0, 1, 1], [], []>} : vector<8x4xf32>, vector<4x144xf32>, vector<8x144xf32> -> vector<8x144xf32>
    %71 = arith.addf %61, %70 : vector<8x144xf32>
    %c7 = arith.constant 7 : index
    %c0_82 = arith.constant 0 : index
    %c0_83 = arith.constant 0 : index
    %72 = vector.load %arg2[%c7, %c0_82, %c0_83] : memref<9x8x4xf32, #tpu.memory_space<vmem>>, vector<1x8x4xf32>
    %73 = vector.shape_cast %72 : vector<1x8x4xf32> to vector<8x4xf32>
    %c0_84 = arith.constant 0 : index
    %c1_85 = arith.constant 1 : index
    %c0_86 = arith.constant 0 : index
    %c18_87 = arith.constant 18 : index
    %74 = vector.load %arg1[%c0_84, %c1_85, %c0_86, %c18_87] : memref<1x2x4x171xf32, #tpu.memory_space<vmem>>, vector<1x1x4x144xf32>
    %75 = vector.shape_cast %74 : vector<1x1x4x144xf32> to vector<4x144xf32>
    %cst_88 = arith.constant dense<0.000000e+00> : vector<8x144xf32>
    %76 = tpu.matmul %73, %75, %cst_88 {dimension_numbers = #tpu.dot_dimension_numbers<[1], [0], [0], [1], [0, 0, 1, 1], [], []>} : vector<8x4xf32>, vector<4x144xf32>, vector<8x144xf32> -> vector<8x144xf32>
    %77 = arith.addf %67, %76 : vector<8x144xf32>
    %c0_89 = arith.constant 0 : index
    %c0_90 = arith.constant 0 : index
    %c0_91 = arith.constant 0 : index
    %c19 = arith.constant 19 : index
    %78 = vector.load %arg1[%c0_89, %c0_90, %c0_91, %c19] : memref<1x2x4x171xf32, #tpu.memory_space<vmem>>, vector<1x1x4x144xf32>
    %79 = vector.shape_cast %78 : vector<1x1x4x144xf32> to vector<4x144xf32>
    %cst_92 = arith.constant dense<0.000000e+00> : vector<8x144xf32>
    %80 = tpu.matmul %73, %79, %cst_92 {dimension_numbers = #tpu.dot_dimension_numbers<[1], [0], [0], [1], [0, 0, 1, 1], [], []>} : vector<8x4xf32>, vector<4x144xf32>, vector<8x144xf32> -> vector<8x144xf32>
    %81 = arith.addf %71, %80 : vector<8x144xf32>
    %c8 = arith.constant 8 : index
    %c0_93 = arith.constant 0 : index
    %c0_94 = arith.constant 0 : index
    %82 = vector.load %arg2[%c8, %c0_93, %c0_94] : memref<9x8x4xf32, #tpu.memory_space<vmem>>, vector<1x8x4xf32>
    %83 = vector.shape_cast %82 : vector<1x8x4xf32> to vector<8x4xf32>
    %c0_95 = arith.constant 0 : index
    %c0_96 = arith.constant 0 : index
    %c0_97 = arith.constant 0 : index
    %c19_98 = arith.constant 19 : index
    %84 = vector.load %arg1[%c0_95, %c0_96, %c0_97, %c19_98] : memref<1x2x4x171xf32, #tpu.memory_space<vmem>>, vector<1x1x4x144xf32>
    %85 = vector.shape_cast %84 : vector<1x1x4x144xf32> to vector<4x144xf32>
    %cst_99 = arith.constant dense<0.000000e+00> : vector<8x144xf32>
    %86 = tpu.matmul %83, %85, %cst_99 {dimension_numbers = #tpu.dot_dimension_numbers<[1], [0], [0], [1], [0, 0, 1, 1], [], []>} : vector<8x4xf32>, vector<4x144xf32>, vector<8x144xf32> -> vector<8x144xf32>
    %87 = arith.addf %77, %86 : vector<8x144xf32>
    %c0_100 = arith.constant 0 : index
    %c1_101 = arith.constant 1 : index
    %c0_102 = arith.constant 0 : index
    %c19_103 = arith.constant 19 : index
    %88 = vector.load %arg1[%c0_100, %c1_101, %c0_102, %c19_103] : memref<1x2x4x171xf32, #tpu.memory_space<vmem>>, vector<1x1x4x144xf32>
    %89 = vector.shape_cast %88 : vector<1x1x4x144xf32> to vector<4x144xf32>
    %cst_104 = arith.constant dense<0.000000e+00> : vector<8x144xf32>
    %90 = tpu.matmul %83, %89, %cst_104 {dimension_numbers = #tpu.dot_dimension_numbers<[1], [0], [0], [1], [0, 0, 1, 1], [], []>} : vector<8x4xf32>, vector<4x144xf32>, vector<8x144xf32> -> vector<8x144xf32>
    %91 = arith.addf %81, %90 : vector<8x144xf32>
    %92 = arith.maximumf %87, %91 : vector<8x144xf32>
    %c0_105 = arith.constant 0 : index
    %c0_106 = arith.constant 0 : index
    %93 = vector.load %arg3[%c0_105, %c0_106] : memref<8x1xf32, #tpu.memory_space<vmem>>, vector<8x1xf32>
    %94 = vector.broadcast %93 : vector<8x1xf32> to vector<8x144xf32>
    %95 = arith.addf %92, %94 : vector<8x144xf32>
    %cst_107 = arith.constant 0.000000e+00 : f32
    %96 = vector.broadcast %cst_107 : f32 to vector<8x144xf32>
    %97 = arith.maximumf %95, %96 : vector<8x144xf32>
    %c0_108 = arith.constant 0 : index
    %c0_109 = arith.constant 0 : index
    %c0_110 = arith.constant 0 : index
    %98 = vector.load %arg4[%c0_108, %c0_109, %c0_110] : memref<1x8x144xf32, #tpu.memory_space<vmem>>, vector<1x8x144xf32>
    %99 = vector.shape_cast %98 : vector<1x8x144xf32> to vector<8x144xf32>
    %100 = vector.shape_cast %97 : vector<8x144xf32> to vector<1x8x144xf32>
    tpu.vector_store %arg4[%c0_108, %c0_109, %c0_110], %100 {strides = array<i32>} : memref<1x8x144xf32, #tpu.memory_space<vmem>>, vector<1x8x144xf32>,
    return
  }
  func.func @transform_0(%arg0: i32) -> (i32, i32, i32, i32) {
    %c0_i32 = arith.constant 0 : i32
    %c0_i32_0 = arith.constant 0 : i32
    %c0_i32_1 = arith.constant 0 : i32
    %c0_i32_2 = arith.constant 0 : i32
    return %arg0, %c0_i32, %c0_i32_0, %c0_i32_1 : i32, i32, i32, i32
  }
  func.func @transform_1(%arg0: i32) -> (i32, i32, i32) {
    %c0_i32 = arith.constant 0 : i32
    %c0_i32_0 = arith.constant 0 : i32
    %c0_i32_1 = arith.constant 0 : i32
    %c0_i32_2 = arith.constant 0 : i32
    return %c0_i32, %c0_i32_0, %c0_i32_1 : i32, i32, i32
  }
  func.func @transform_2(%arg0: i32) -> (i32, i32) {
    %c0_i32 = arith.constant 0 : i32
    %c0_i32_0 = arith.constant 0 : i32
    %c0_i32_1 = arith.constant 0 : i32
    return %c0_i32, %c0_i32_0 : i32, i32
  }
  func.func @transform_3(%arg0: i32) -> (i32, i32, i32) {
    %c0_i32 = arith.constant 0 : i32
    %c0_i32_0 = arith.constant 0 : i32
    %c0_i32_1 = arith.constant 0 : i32
    return %arg0, %c0_i32, %c0_i32_0 : i32, i32, i32
  }
}

</mosaic_0001>

<bundles_post_ra>
// kernel: conv2dblock_forward.1
= control target key start
LH: loop header
LB: loop body
LE: loop exit
PB: predicated region body
PF: predicated region fallthrough
CT: control target
= control target key end

     0   :  { %s1899_s12 = smov 0   ;;  %s2035_s0 = inlined_call_operand.vmem [shape: f32[2,2,4,171], index: 0, kind: input, shape index: {}]   ;;  %s2036_s1 = inlined_call_operand.vmem [shape: f32[9,8,4], index: 1, kind: input, shape index: {}]   ;;  %s2037_s2 = inlined_call_operand.vmem [shape: f32[8,1], index: 2, kind: input, shape index: {}]   ;;  %s2038_s3 = inlined_call_operand.vmem [shape: f32[2,8,144], index: 3, kind: output, shape index: {}]  }
   0x1 LB: > { %s1733_s13 = sadd.s32 4294967295, %s1870_s12   ;;  %p1737_p0 = scmp.ge.s32.totalorder %s1870_s12, 1  ;;  %s1870_s12 = sphi %s1899_s12, %s13_s12  }
   0x2   : > { %p137_p1 = scmp.lt.s32.totalorder %s1870_s12, 3 }
   0x4   : > { %p138_p2 = pnand %p1737_p0, %p137_p1 }
   0x5   : > { %p161_p3 = scmp.lt.s32.totalorder (!%p138_p2), %s1733_s13, 1  ;;  %v1872_v0 = vmov (!%p138_p2), 0.0   ;;  %vm183_vm0 = vcmask (!%p138_p2), 1043456   ;;  %s1873_s18 = smov (!%p138_p2), 127   ;;  %v1743_v5 = vld [vmem:[%s2036_s1 + $0x8] sm:$0xff] (!%p138_p2)  ;;  %vm179_vm1 = vcmask (!%p138_p2), 31744  }
   0x6   : > { %141 = sbr.rel (%p138_p2) target bundleno = 422 (0x1a6), region = 32  ;;  %252 = vmatprep.mubr.f32.mxu0 (!%p138_p2), %v1872_v0  ;;  %416 = vmatprep.mubr.f32.mxu1 (!%p138_p2), %v1872_v0  ;;  %s1874_s21 = smov (!%p138_p2), 119   ;;  %v171_v6 = vld [vmem:[%s2036_s1] sm:$0xff] (!%p138_p2)  ;;  %v1878_v8 = vmov (!%p138_p2), 0   ;;  %vm346_vm2 = vcmask (!%p138_p2), 1039360   ;;  %v1756_v14 = vld [vmem:[%s2036_s1 + $0x10] sm:$0xff] (!%p138_p2) }
   0x7   : > { %s1875_s24 = smov (!%p138_p2), 118   ;;  %s1876_s25 = smov (!%p138_p2), 110   ;;  %v1665_v7 = vld [vmem:[%s2037_s2] sm:$0xff] (!%p138_p2)  ;;  %1861 = vset.pattern.permute.xlu0 (!%p138_p2), %v1878_v8  ;;  %vm666_vm3 = vcmask (!%p138_p2), 973824   ;;  %v1764_v21 = vld [vmem:[%s2036_s1 + $0x18] sm:$0xff] (!%p138_p2)  ;;  %vm918_vm4 = vcmask (!%p138_p2), 965632  }
   0x8   : > { %s1877_s26 = smov (!%p138_p2), 109   ;;  %v1772_v26 = vld [vmem:[%s2036_s1 + $0x20] sm:$0xff] (!%p138_p2)  ;;  %vm1169_vm5 = vcmask (!%p138_p2), 900096   ;;  %v1779_v31 = vld [vmem:[%s2036_s1 + $0x28] sm:$0xff] (!%p138_p2)  ;;  %v1787_v36 = vld [vmem:[%s2036_s1 + $0x30] sm:$0xff] (!%p138_p2)  ;;  %vm1421_vm6 = vcmask (!%p138_p2), 891904  }
   0x9   : > { %v1795_v40 = vld [vmem:[%s2036_s1 + $0x38] sm:$0xff] (!%p138_p2)  ;;  %v1802_v42 = vld [vmem:[%s2036_s1 + $0x40] sm:$0xff] (!%p138_p2)  ;;  %vm1676_vm7 = vcmask (!%p138_p2), 130048  }
   0xd   : > { %s2040_s13 = smov (!%p161_p3, %s1733_s13), 1 }
   0xe   : > { %s1812_s14 = sshll.u32 %s2040_s13, 4 }
   0xf   : > { %s165_s17 = scalar_lea.vmem %s2035_s0, %s1812_s14 }
  0x10   : > { %v339_v1 = vld [vmem:[%s165_s17] sm:$0xff]  ;;  %v1760_v2 = vld [vmem:[%s165_s17 + $0x8] sm:$0xff] }
  0x11   : > { %342 = vrot.lane.b32.xlu0 %v339_v1, %s1873_s18  ;;  %v341_v3 = vcombine.high %v339_v1, %v339_v1  ;;  %575 = vrot.lane.b32.xlu1 %v1760_v2, %s1873_s18  ;;  %v574_v4 = vcombine.high %v1760_v2, %v1760_v2 }
  0x13   : > { %1744 = vmatprep.subr.msk.mxu0 %vm183_vm0, %v574_v4 }
  0x14   : > { %1745 = vmatpush1.msk.msra.mxu0 %vm183_vm0, %v1760_v2 }
  0x15   : > { %344 = vrot.lane.b32.xlu0 %v341_v3, %s1873_s18  ;;  %577 = vrot.lane.b32.xlu1 %v574_v4, %s1873_s18 }
  0x16   : > { %1746 = vmatmul.mubr.msk.f32.vlgmr.msra.gmra.mrb[0].mxu0 %vm179_vm1, %v1743_v5  ;;  %1747 = vmatprep.subr.msk.mxu0 %vm183_vm0, %v341_v3 }
  0x17   : > { %1748 = vmatpush1.msk.msra.mxu0 %vm183_vm0, %v339_v1  ;;  %332 = vmatprep.mubr.f32.mxu0 %v1872_v0 }
  0x19   : > { %664 = vrot.lane.b32.xlu1 %v341_v3, %s1874_s21  ;;  %662 = vrot.lane.b32.xlu0 %v339_v1, %s1874_s21 }
  0x1d   : > { %753 = vrot.lane.b32.xlu1 %v574_v4, %s1874_s21  ;;  %751 = vrot.lane.b32.xlu0 %v1760_v2, %s1874_s21  ;;  %s170_s21 = scalar_lea.vmem %s2038_s3, %s1812_s14 }
  0x1e   : > { %1749 = vmatmul.mubr.msk.f32.vlgmr.msra.gmra.mrb[0].mxu0 %vm179_vm1, %v171_v6 }
  0x1f   : > { %563 = vmatprep.mubr.f32.mxu0 %v1872_v0 }
  0x21   : > { %916 = vrot.lane.b32.xlu1 %v341_v3, %s1875_s24  ;;  %914 = vrot.lane.b32.xlu0 %v339_v1, %s1875_s24 }
  0x25   : > { %1080 = vrot.lane.b32.xlu1 %v574_v4, %s1875_s24  ;;  %1078 = vrot.lane.b32.xlu0 %v1760_v2, %s1875_s24 }
  0x29   : > { %1167 = vrot.lane.b32.xlu1 %v341_v3, %s1876_s25  ;;  %1165 = vrot.lane.b32.xlu0 %v339_v1, %s1876_s25 }
  0x2d   : > { %1256 = vrot.lane.b32.xlu1 %v574_v4, %s1876_s25  ;;  %1254 = vrot.lane.b32.xlu0 %v1760_v2, %s1876_s25 }
  0x31   : > { %1419 = vrot.lane.b32.xlu1 %v341_v3, %s1877_s26  ;;  %1417 = vrot.lane.b32.xlu0 %v339_v1, %s1877_s26 }
  0x35   : > { %1583 = vrot.lane.b32.xlu1 %v574_v4, %s1877_s26  ;;  %1581 = vrot.lane.b32.xlu0 %v1760_v2, %s1877_s26 }
  0x39   : > { %1668 = vperm.xlu0 %1861, %v1665_v7  }
  0x83   : > { %v343_v9 = vpop.permute.xlu0 %342  ;;  %v576_v10 = vpop.permute.xlu1 %575 }
  0x87   : > { %v345_v11 = vpop.permute.xlu0 %344  ;;  %v578_v12 = vpop.permute.xlu1 %577 }
  0x88   : > { %1750 = vmatprep.subr.msk.mxu1 %vm183_vm0, %v345_v11  ;;  %1757 = vmatprep.subr.msk.mxu0 %vm183_vm0, %v345_v11  ;;  %v347_v13 = vsel %vm346_vm2, %v343_v9, %v345_v11  ;;  %v579_v20 = vsel %vm346_vm2, %v576_v10, %v578_v12 }
  0x89   : > { %1751 = vmatpush1.msk.msra.mxu1 %vm183_vm0, %v347_v13  ;;  %1758 = vmatpush1.msk.msra.mxu0 %vm183_vm0, %v347_v13 }
  0x8a   : > { %1752 = vmatmul.mubr.msk.f32.vlgmr.msra.gmra.mrb[0].mxu1 %vm179_vm1, %v1743_v5  ;;  %1753 = vmatprep.subr.msk.mxu1 %vm183_vm0, %v574_v4 }
  0x8b   : > { %1759 = vmatmul.mubr.msk.f32.vlgmr.msra.gmra.mrb[0].mxu0 %vm179_vm1, %v1756_v14  ;;  %1754 = vmatpush1.msk.msra.mxu1 %vm183_vm0, %v1760_v2  ;;  %v665_v15 = vpop.permute.xlu1 %664  ;;  %v663_v16 = vpop.permute.xlu0 %662 }
  0x8c   : > { %v667_v17 = vsel %vm666_vm3, %v663_v16, %v665_v15  ;;  %1765 = vmatprep.subr.msk.mxu0 %vm183_vm0, %v665_v15  ;;  %487 = vmatprep.mubr.f32.mxu1 %v1872_v0 }
  0x8d   : > { %1761 = vmatprep.subr.msk.mxu1 %vm183_vm0, %v578_v12  ;;  %1766 = vmatpush1.msk.msra.mxu0 %vm183_vm0, %v667_v17 }
  0x8e   : > { %739 = vmatprep.mubr.f32.mxu0 %v1872_v0 }
  0x8f   : > { %v754_v18 = vpop.permute.xlu1 %753  ;;  %v752_v19 = vpop.permute.xlu0 %751 }
  0x90   : > { %1773 = vmatprep.subr.msk.mxu0 %vm183_vm0, %v754_v18  ;;  %v755_v22 = vsel %vm666_vm3, %v752_v19, %v754_v18 }
  0x92   : > { %1755 = vmatmul.mubr.msk.f32.vlgmr.msra.gmra.mrb[0].mxu1 %vm179_vm1, %v171_v6 }
  0x93   : > { %1762 = vmatpush1.msk.msra.mxu1 %vm183_vm0, %v579_v20  ;;  %1767 = vmatmul.mubr.msk.f32.vlgmr.msra.gmra.mrb[0].mxu0 %vm179_vm1, %v1764_v21  ;;  %v917_v23 = vpop.permute.xlu1 %916  ;;  %v915_v24 = vpop.permute.xlu0 %914 }
  0x94   : > { %648 = vmatprep.mubr.f32.mxu1 %v1872_v0  ;;  %1774 = vmatpush1.msk.msra.mxu0 %vm183_vm0, %v755_v22  ;;  %v919_v28 = vsel %vm918_vm4, %v915_v24, %v917_v23 }
  0x95   : > { %902 = vmatprep.mubr.f32.mxu0 %v1872_v0  ;;  %1769 = vmatprep.subr.msk.mxu1 %vm183_vm0, %v754_v18 }
  0x96   : > { %1780 = vmatprep.subr.msk.mxu0 %vm183_vm0, %v917_v23 }
  0x97   : > { %v1081_v25 = vpop.permute.xlu1 %1080  ;;  %v1079_v27 = vpop.permute.xlu0 %1078 }
  0x98   : > { %v1082_v35 = vsel %vm918_vm4, %v1079_v27, %v1081_v25 }
  0x9a   : > { %1763 = vmatmul.mubr.msk.f32.vlgmr.msra.gmra.mrb[0].mxu1 %vm179_vm1, %v1756_v14 }
  0x9b   : > { %1775 = vmatmul.mubr.msk.f32.vlgmr.msra.gmra.mrb[0].mxu0 %vm179_vm1, %v1772_v26  ;;  %1770 = vmatpush1.msk.msra.mxu1 %vm183_vm0, %v755_v22  ;;  %v1168_v29 = vpop.permute.xlu1 %1167  ;;  %v1166_v30 = vpop.permute.xlu0 %1165 }
  0x9c   : > { %824 = vmatprep.mubr.f32.mxu1 %v1872_v0  ;;  %1781 = vmatpush1.msk.msra.mxu0 %vm183_vm0, %v919_v28  ;;  %v1170_v32 = vsel %vm1169_vm5, %v1166_v30, %v1168_v29 }
  0x9d   : > { %1066 = vmatprep.mubr.f32.mxu0 %v1872_v0  ;;  %1776 = vmatprep.subr.msk.mxu1 %vm183_vm0, %v917_v23 }
  0x9e   : > { %1788 = vmatprep.subr.msk.mxu0 %vm183_vm0, %v1168_v29 }
  0x9f   : > { %v1257_v33 = vpop.permute.xlu1 %1256  ;;  %v1255_v34 = vpop.permute.xlu0 %1254 }
  0xa0   : > { %v1258_v37 = vsel %vm1169_vm5, %v1255_v34, %v1257_v33 }
  0xa2   : > { %1771 = vmatmul.mubr.msk.f32.vlgmr.msra.gmra.mrb[0].mxu1 %vm179_vm1, %v1764_v21 }
  0xa3   : > { %1782 = vmatmul.mubr.msk.f32.vlgmr.msra.gmra.mrb[0].mxu0 %vm179_vm1, %v1779_v31  ;;  %1777 = vmatpush1.msk.msra.mxu1 %vm183_vm0, %v919_v28  ;;  %v1420_v38 = vpop.permute.xlu1 %1419  ;;  %v1418_v39 = vpop.permute.xlu0 %1417 }
  0xa4   : > { %988 = vmatprep.mubr.f32.mxu1 %v1872_v0  ;;  %1789 = vmatpush1.msk.msra.mxu0 %vm183_vm0, %v1170_v32  ;;  %v1422_v41 = vsel %vm1421_vm6, %v1418_v39, %v1420_v38 }
  0xa5   : > { %1242 = vmatprep.mubr.f32.mxu0 %v1872_v0  ;;  %1784 = vmatprep.subr.msk.mxu1 %vm183_vm0, %v1081_v25 }
  0xa6   : > { %1796 = vmatprep.subr.msk.mxu0 %vm183_vm0, %v1257_v33 }
  0xa7   : > { %v1584_v43 = vpop.permute.xlu1 %1583  ;;  %v1582_v44 = vpop.permute.xlu0 %1581 }
  0xa8   : > { %v1585_v45 = vsel %vm1421_vm6, %v1582_v44, %v1584_v43 }
  0xaa   : > { %1778 = vmatmul.mubr.msk.f32.vlgmr.msra.gmra.mrb[0].mxu1 %vm179_vm1, %v1772_v26 }
  0xab   : > { %1790 = vmatmul.mubr.msk.f32.vlgmr.msra.gmra.mrb[0].mxu0 %vm179_vm1, %v1787_v36  ;;  %1785 = vmatpush1.msk.msra.mxu1 %vm183_vm0, %v1082_v35 }
  0xac   : > { %1151 = vmatprep.mubr.f32.mxu1 %v1872_v0  ;;  %1797 = vmatpush1.msk.msra.mxu0 %vm183_vm0, %v1258_v37 }
  0xad   : > { %1405 = vmatprep.mubr.f32.mxu0 %v1872_v0  ;;  %1792 = vmatprep.subr.msk.mxu1 %vm183_vm0, %v1257_v33 }
  0xae   : > { %1803 = vmatprep.subr.msk.mxu0 %vm183_vm0, %v1420_v38 }
  0xb2   : > { %1786 = vmatmul.mubr.msk.f32.vlgmr.msra.gmra.mrb[0].mxu1 %vm179_vm1, %v1779_v31 }
  0xb3   : > { %1798 = vmatmul.mubr.msk.f32.vlgmr.msra.gmra.mrb[0].mxu0 %vm179_vm1, %v1795_v40  ;;  %1793 = vmatpush1.msk.msra.mxu1 %vm183_vm0, %v1258_v37 }
  0xb4   : > { %1327 = vmatprep.mubr.f32.mxu1 %v1872_v0  ;;  %1804 = vmatpush1.msk.msra.mxu0 %vm183_vm0, %v1422_v41 }
  0xb5   : > { %1569 = vmatprep.mubr.f32.mxu0 %v1872_v0  ;;  %1799 = vmatprep.subr.msk.mxu1 %vm183_vm0, %v1420_v38 }
  0xb8   : > { %v1669_v49 = vpop.permute.xlu0 %1668 }
  0xba   : > { %1794 = vmatmul.mubr.msk.f32.vlgmr.msra.gmra.mrb[0].mxu1 %vm179_vm1, %v1787_v36 }
  0xbb   : > { %1805 = vmatmul.mubr.msk.f32.vlgmr.msra.gmra.mrb[0].mxu0 %vm179_vm1, %v1802_v42  ;;  %1800 = vmatpush1.msk.msra.mxu1 %vm183_vm0, %v1422_v41 }
  0xbc   : > { %1491 = vmatprep.mubr.f32.mxu1 %v1872_v0  ;;  %1807 = vmatprep.subr.msk.mxu1 %vm183_vm0, %v1584_v43 }
  0xc2   : > { %1801 = vmatmul.mubr.msk.f32.vlgmr.msra.gmra.mrb[0].mxu1 %vm179_vm1, %v1795_v40 }
  0xc3   : > { %1808 = vmatpush1.msk.msra.mxu1 %vm183_vm0, %v1585_v45  ;;  %1654 = vmatprep.mubr.f32.mxu1 %v1872_v0 }
  0xca   : > { %1809 = vmatmul.mubr.msk.f32.vlgmr.msra.gmra.mrb[0].mxu1 %vm179_vm1, %v1802_v42 }
 0x18e   : > { %v1571_v46 = vpop.f32.mrb[0].mxu0 }
 0x18f   : > { %v1573_v47 = vpop.f32.mrb[1].mxu0 }
 0x19d   : > { %v1656_v48 = vpop.f32.mrb[0].mxu1 }
 0x19e   : > { %v1663_v50 = vmax.f32 %v1571_v46, %v1656_v48  ;;  %v1658_v51 = vpop.f32.mrb[1].mxu1 }
 0x19f   : > { %v1664_v52 = vmax.f32 %v1573_v47, %v1658_v51 }
 0x1a0   : > { %v1671_v53 = vadd.f32 %v1669_v49, %v1663_v50 }
 0x1a1   : > { %v1672_v54 = vadd.f32 %v1669_v49, %v1664_v52 }
 0x1a2   : > { %v1673_v55 = vmax.f32 %v1671_v53, 0.0 }
 0x1a3   : > { %v1674_v56 = vmax.f32 %v1672_v54, 0.0 }
 0x1a4   : > { %1675 = vst [vmem:[%s170_s21] sm:$0xff] %v1673_v55 }
 0x1a5   : > { %1677 = vst.msk [vmem:[%s170_s21 + $0x8] sm:$0xff] %vm1676_vm7, %v1674_v56 }
 0x1a6 PF: > { %s13_s12 = sadd.s32 1, %s1870_s12  }
 0x1a7   : > { %p10_p4 = scmp.ge.s32.totalorder %s13_s12, 4  }
 0x1a9   :  { %12 = sbr.rel (!%p10_p4) target bundleno = 1 (0x1), region = 71 }

</bundles_post_ra>
